<compile_context>
chip_gen: v5e
topology: v5e:2x2
jax: 0.10.0
libtpu: 0.0.40
codegen_flags: <defaults>
</compile_context>

<pallas_src>
import jax
import jax.numpy as jnp
from jax.experimental import pallas as pl
from jax.experimental.pallas import tpu as pltpu

_LANE = 128     # lane width (last vreg dim)
_SUBLANE = 8    # f32 sublane granularity (second-to-last dim)


def _round_up(x, m):
    return (x + m - 1) // m * m


# -----------------------------------------------------------------------------
# Kernel: fused Linear -> ReLU -> Linear over one batch tile.
# -----------------------------------------------------------------------------
def mlp_kernel(x_ref, w1_ref, b1_ref, w2_ref, b2_ref, o_ref, h_ref):
    # Layer 1: x @ W1 on the MXU with f32 accumulation; the activation tile is
    # cast to the MXU input dtype (bf16 by default) on the fly.
    h = jnp.dot(x_ref[...].astype(w1_ref.dtype), w1_ref[...],
                preferred_element_type=jnp.float32)
    # Bias + ReLU epilogue in f32 (v5e has no bf16 VALU), then park the layer-1
    # activation in a deterministic VMEM scratch in the MXU input dtype.
    h_ref[...] = jnp.maximum(h + b1_ref[...], 0.0).astype(h_ref.dtype)
    # Layer 2: h @ W2 + b2; cast to the output dtype only at the final store.
    out = jnp.dot(h_ref[...], w2_ref[...], preferred_element_type=jnp.float32)
    o_ref[...] = (out + b2_ref[...]).astype(o_ref.dtype)


# -----------------------------------------------------------------------------
# One-time parameter prep (NOT on the per-step path).
# -----------------------------------------------------------------------------
def prepare_params(w1, b1, w2, b2, *, mxu_dtype=jnp.bfloat16):
    """Pad + cast parameters once at setup time.

    Weights are stored pre-transposed as [in, out] (y = x @ W + b, matching
    PyTorch nn.Linear's y = x W^T + b).  Only the hidden dim -- which never
    touches HBM activations -- is zero-padded to a lane multiple so the layer-1
    output / layer-2 contraction are lane-aligned; this is exact through
    Linear -> ReLU -> Linear.  Weights go to the MXU input dtype, biases stay
    f32 for the epilogue.
    """
    d_in, d_hid = w1.shape
    d_out = w2.shape[1]
    hid_p = _round_up(d_hid, _LANE)
    w1p = jnp.zeros((d_in, hid_p), mxu_dtype).at[:, :d_hid].set(w1.astype(mxu_dtype))
    b1p = jnp.zeros((1, hid_p), jnp.float32).at[0, :d_hid].set(b1.astype(jnp.float32))
    w2p = jnp.zeros((hid_p, d_out), mxu_dtype).at[:d_hid, :].set(w2.astype(mxu_dtype))
    b2p = b2.astype(jnp.float32).reshape(1, d_out)
    return dict(w1=w1p, b1=b1p, w2=w2p, b2=b2p, d_hid=d_hid)


def _choose_tile_m(batch, tile_m):
    # >= 2 grid steps whenever the batch can be split at sublane granularity
    # (v7x has 2 TensorCores), tiles <= tile_m rows, and a tm that divides the
    # batch with only a few rows of padding (no fixed round-up to 512).
    if batch <= _SUBLANE:
        return _round_up(batch, _SUBLANE)
    num_tiles = max(2, pl.cdiv(batch, tile_m))
    return min(tile_m, _round_up(pl.cdiv(batch, num_tiles), _SUBLANE))


def _vmem_pad_bytes(rows, cols, dtype):
    # VMEM allocations round up to the (8, 128) vreg-tile grid (sub-32-bit
    # sublane packing ignored -> slight over-estimate, i.e. the safe side).
    return (_round_up(max(rows, 1), _SUBLANE)
            * _round_up(max(cols, 1), _LANE)
            * jnp.dtype(dtype).itemsize)


# -----------------------------------------------------------------------------
# Forward wrapper.
# -----------------------------------------------------------------------------
def simplenet_forward(x, params, *, tile_m=256):
    """x: [B, d_in] -> [B, d_out].  `params` comes from prepare_params()."""
    w1p, b1p, w2p, b2p = params["w1"], params["b1"], params["w2"], params["b2"]
    d_hid = params["d_hid"]
    B, d_in = x.shape
    hid_p = w1p.shape[1]
    d_out = w2p.shape[1]
    out_dtype = x.dtype
    mxu_dtype = w1p.dtype

    # Batch tiling: minimal padding, >= 2 grid steps when possible.
    tm = _choose_tile_m(B, tile_m)
    b_p = _round_up(B, tm)
    if b_p != B:
        x = jnp.pad(x, ((0, b_p - B), (0, 0)))  # batch-only padding, sliced off below
    grid = (b_p // tm,)

    # Advisory cost from the TRUE problem dims (not padded ones).
    itemsize = jnp.dtype(out_dtype).itemsize
    cost = pl.CostEstimate(
        flops=2 * B * (d_in * d_hid + d_hid * d_out),
        transcendentals=0,
        bytes_accessed=int(
            B * d_in * itemsize
            + (d_in * d_hid + d_hid * d_out) * jnp.dtype(mxu_dtype).itemsize
            + (d_hid + d_out) * 4
            + B * d_out * itemsize),
    )

    # Explicit VMEM budget: double-buffered streamed tiles + single-buffered
    # resident weights + the h scratch, 2x headroom, capped at v7x's 64 MiB
    # physical VMEM (v5e's default scoped limit is only 16 MiB).
    vmem_needed = (
        2 * _vmem_pad_bytes(tm, d_in, x.dtype)          # streamed activation tiles
        + 2 * _vmem_pad_bytes(tm, d_out, out_dtype)     # streamed output tiles
        + _vmem_pad_bytes(d_in, hid_p, mxu_dtype)       # resident W1
        + _vmem_pad_bytes(1, hid_p, jnp.float32)        # resident b1
        + _vmem_pad_bytes(hid_p, d_out, mxu_dtype)      # resident W2
        + _vmem_pad_bytes(1, d_out, jnp.float32)        # resident b2
        + _vmem_pad_bytes(tm, hid_p, mxu_dtype))        # h scratch
    vmem_limit = int(min(64 * 2 ** 20, max(32 * 2 ** 20, 2 * vmem_needed)))

    resident = dict(pipeline_mode=pl.Buffered(1))  # constant index_map -> 1 buffer

    out = pl.pallas_call(
        mlp_kernel,
        out_shape=jax.ShapeDtypeStruct((b_p, d_out), out_dtype),
        grid=grid,
        in_specs=[
            # Activation tile streams over the batch grid (double-buffered DMA);
            # unpadded [*, d_in]: last dim = full array extent (legal, lean DMA).
            pl.BlockSpec((tm, d_in), lambda i: (i, 0)),
            # Weights / biases: constant block index -> DMA'd once, VMEM-resident,
            # single-buffered.
            pl.BlockSpec((d_in, hid_p), lambda i: (0, 0), **resident),
            pl.BlockSpec((1, hid_p), lambda i: (0, 0), **resident),
            pl.BlockSpec((hid_p, d_out), lambda i: (0, 0), **resident),
            pl.BlockSpec((1, d_out), lambda i: (0, 0), **resident),
        ],
        out_specs=pl.BlockSpec((tm, d_out), lambda i: (i, 0)),
        scratch_shapes=[pltpu.VMEM((tm, hid_p), mxu_dtype)],
        compiler_params=pltpu.CompilerParams(
            # Batch tiles are independent: shard across TensorCores on v7x (2 TCs).
            dimension_semantics=("parallel",),
            vmem_limit_bytes=vmem_limit,
        ),
        cost_estimate=cost,
    )(x, w1p, b1p, w2p, b2p)

    return out[:B]


def reference_forward(x, w1, b1, w2, b2):
    h = jnp.maximum(x @ w1 + b1, 0.0)
    return h @ w2 + b2


if __name__ == "__main__":
    # Shapes implied by SimpleNet(input_size, hidden_size, output_size).
    batch, input_size, hidden_size, output_size = 8, 16, 32, 8

    key = jax.random.PRNGKey(0)
    kx, k1, k2, k3, k4 = jax.random.split(key, 5)

    x = jax.random.normal(kx, (batch, input_size), dtype=jnp.float32)

    # Deterministic PyTorch nn.Linear-style uniform init, stored pre-transposed
    # as [in, out].
    bound1 = 1.0 / jnp.sqrt(input_size)
    w1 = jax.random.uniform(k1, (input_size, hidden_size),
                            minval=-bound1, maxval=bound1, dtype=jnp.float32)
    b1 = jax.random.uniform(k2, (hidden_size,),
                            minval=-bound1, maxval=bound1, dtype=jnp.float32)
    bound2 = 1.0 / jnp.sqrt(hidden_size)
    w2 = jax.random.uniform(k3, (hidden_size, output_size),
                            minval=-bound2, maxval=bound2, dtype=jnp.float32)
    b2 = jax.random.uniform(k4, (output_size,),
                            minval=-bound2, maxval=bound2, dtype=jnp.float32)

    ref = reference_forward(x, w1, b1, w2, b2)

    # Default / optimized path: bf16 MXU inputs, f32 accumulation + epilogue.
    params_bf16 = prepare_params(w1, b1, w2, b2, mxu_dtype=jnp.bfloat16)
    out = jax.block_until_ready(simplenet_forward(x, params_bf16))
    assert out.shape == (batch, output_size)
    assert jnp.allclose(out, ref, atol=5e-2, rtol=5e-2), \
        float(jnp.max(jnp.abs(out - ref)))

    # Full-precision path: exact match against the f32 reference.
    params_f32 = prepare_params(w1, b1, w2, b2, mxu_dtype=jnp.float32)
    out_f32 = jax.block_until_ready(simplenet_forward(x, params_f32))
    assert jnp.allclose(out_f32, ref, atol=1e-5, rtol=1e-5), \
        float(jnp.max(jnp.abs(out_f32 - ref)))

    print("KERNEL_OK")
</pallas_src>

<mosaic_0001>
module attributes {stable_mosaic.version = 11 : i64} {
  func.func @mlp_kernel(%arg0: i32, %arg1: memref<8x16xf32, #tpu.memory_space<vmem>>, %arg2: memref<16x128xbf16, #tpu.memory_space<vmem>>, %arg3: memref<1x128xf32, #tpu.memory_space<vmem>>, %arg4: memref<128x8xbf16, #tpu.memory_space<vmem>>, %arg5: memref<1x8xf32, #tpu.memory_space<vmem>>, %arg6: memref<8x8xf32, #tpu.memory_space<vmem>>, %arg7: memref<8x128xbf16, #tpu.memory_space<vmem>>) attributes {dimension_semantics = [#tpu.dimension_semantics<parallel>], iteration_bounds = array<i64: 1>, scalar_prefetch = 0 : i64, scratch_operands = 1 : i64, tpu.core_type = #tpu.core_type<tc>, window_params = [{transform_indices = @transform_0, window_bounds = array<i64: 8, 16>}, {pipeline_mode = #tpu.pipeline_mode<synchronous>, transform_indices = @transform_1, window_bounds = array<i64: 16, 128>}, {pipeline_mode = #tpu.pipeline_mode<synchronous>, transform_indices = @transform_2, window_bounds = array<i64: 1, 128>}, {pipeline_mode = #tpu.pipeline_mode<synchronous>, transform_indices = @transform_3, window_bounds = array<i64: 128, 8>}, {pipeline_mode = #tpu.pipeline_mode<synchronous>, transform_indices = @transform_4, window_bounds = array<i64: 1, 8>}, {transform_indices = @transform_5, window_bounds = array<i64: 8, 8>}]} {
    %c0 = arith.constant 0 : index
    %c0_0 = arith.constant 0 : index
    %0 = vector.load %arg1[%c0, %c0_0] : memref<8x16xf32, #tpu.memory_space<vmem>>, vector<8x16xf32>
    %1 = arith.truncf %0 : vector<8x16xf32> to vector<8x16xbf16>
    %c0_1 = arith.constant 0 : index
    %c0_2 = arith.constant 0 : index
    %2 = vector.load %arg2[%c0_1, %c0_2] : memref<16x128xbf16, #tpu.memory_space<vmem>>, vector<16x128xbf16>
    %cst = arith.constant dense<0.000000e+00> : vector<8x128xf32>
    %3 = tpu.matmul %1, %2, %cst {dimension_numbers = #tpu.dot_dimension_numbers<[1], [0], [0], [1], [0, 0, 1, 1], [], []>} : vector<8x16xbf16>, vector<16x128xbf16>, vector<8x128xf32> -> vector<8x128xf32>
    %c0_3 = arith.constant 0 : index
    %c0_4 = arith.constant 0 : index
    %4 = vector.load %arg3[%c0_3, %c0_4] : memref<1x128xf32, #tpu.memory_space<vmem>>, vector<1x128xf32>
    %5 = vector.broadcast %4 : vector<1x128xf32> to vector<8x128xf32>
    %6 = arith.addf %3, %5 : vector<8x128xf32>
    %cst_5 = arith.constant 0.000000e+00 : f32
    %7 = vector.broadcast %cst_5 : f32 to vector<8x128xf32>
    %8 = arith.maximumf %6, %7 : vector<8x128xf32>
    %9 = arith.truncf %8 : vector<8x128xf32> to vector<8x128xbf16>
    %c0_6 = arith.constant 0 : index
    %c0_7 = arith.constant 0 : index
    %10 = vector.load %arg7[%c0_6, %c0_7] : memref<8x128xbf16, #tpu.memory_space<vmem>>, vector<8x128xbf16>
    tpu.vector_store %arg7[%c0_6, %c0_7], %9 {strides = array<i32>} : memref<8x128xbf16, #tpu.memory_space<vmem>>, vector<8x128xbf16>,
    %c0_8 = arith.constant 0 : index
    %c0_9 = arith.constant 0 : index
    %11 = vector.load %arg7[%c0_8, %c0_9] : memref<8x128xbf16, #tpu.memory_space<vmem>>, vector<8x128xbf16>
    %c0_10 = arith.constant 0 : index
    %c0_11 = arith.constant 0 : index
    %12 = vector.load %arg4[%c0_10, %c0_11] : memref<128x8xbf16, #tpu.memory_space<vmem>>, vector<128x8xbf16>
    %cst_12 = arith.constant dense<0.000000e+00> : vector<8x8xf32>
    %13 = tpu.matmul %11, %12, %cst_12 {dimension_numbers = #tpu.dot_dimension_numbers<[1], [0], [0], [1], [0, 0, 1, 1], [], []>} : vector<8x128xbf16>, vector<128x8xbf16>, vector<8x8xf32> -> vector<8x8xf32>
    %c0_13 = arith.constant 0 : index
    %c0_14 = arith.constant 0 : index
    %14 = vector.load %arg5[%c0_13, %c0_14] : memref<1x8xf32, #tpu.memory_space<vmem>>, vector<1x8xf32>
    %15 = vector.broadcast %14 : vector<1x8xf32> to vector<8x8xf32>
    %16 = arith.addf %13, %15 : vector<8x8xf32>
    %c0_15 = arith.constant 0 : index
    %c0_16 = arith.constant 0 : index
    %17 = vector.load %arg6[%c0_15, %c0_16] : memref<8x8xf32, #tpu.memory_space<vmem>>, vector<8x8xf32>
    tpu.vector_store %arg6[%c0_15, %c0_16], %16 {strides = array<i32>} : memref<8x8xf32, #tpu.memory_space<vmem>>, vector<8x8xf32>,
    return
  }
  func.func @transform_0(%arg0: i32) -> (i32, i32) {
    %c0_i32 = arith.constant 0 : i32
    %c0_i32_0 = arith.constant 0 : i32
    return %arg0, %c0_i32 : i32, i32
  }
  func.func @transform_1(%arg0: i32) -> (i32, i32) {
    %c0_i32 = arith.constant 0 : i32
    %c0_i32_0 = arith.constant 0 : i32
    %c0_i32_1 = arith.constant 0 : i32
    return %c0_i32, %c0_i32_0 : i32, i32
  }
  func.func @transform_2(%arg0: i32) -> (i32, i32) {
    %c0_i32 = arith.constant 0 : i32
    %c0_i32_0 = arith.constant 0 : i32
    %c0_i32_1 = arith.constant 0 : i32
    return %c0_i32, %c0_i32_0 : i32, i32
  }
  func.func @transform_3(%arg0: i32) -> (i32, i32) {
    %c0_i32 = arith.constant 0 : i32
    %c0_i32_0 = arith.constant 0 : i32
    %c0_i32_1 = arith.constant 0 : i32
    return %c0_i32, %c0_i32_0 : i32, i32
  }
  func.func @transform_4(%arg0: i32) -> (i32, i32) {
    %c0_i32 = arith.constant 0 : i32
    %c0_i32_0 = arith.constant 0 : i32
    %c0_i32_1 = arith.constant 0 : i32
    return %c0_i32, %c0_i32_0 : i32, i32
  }
  func.func @transform_5(%arg0: i32) -> (i32, i32) {
    %c0_i32 = arith.constant 0 : i32
    %c0_i32_0 = arith.constant 0 : i32
    return %arg0, %c0_i32 : i32, i32
  }
}

</mosaic_0001>

<bundles_post_ra>
// kernel: tpu_custom_call.1
= control target key start
LH: loop header
LB: loop body
LE: loop exit
PB: predicated region body
PF: predicated region fallthrough
CT: control target
= control target key end

     0   :  { %vm36_vm0 = vcmask 130048   ;;  %s301_s0 = inlined_call_operand.vmem [shape: f32[8,16], index: 0, kind: input, shape index: {}]   ;;  %s302_s1 = inlined_call_operand.vmem [shape: bf16[16,128], index: 1, kind: input, shape index: {}]   ;;  %s303_s2 = inlined_call_operand.vmem [shape: f32[1,128], index: 2, kind: input, shape index: {}]   ;;  %s304_s3 = inlined_call_operand.vmem [shape: bf16[128,8], index: 3, kind: input, shape index: {}]   ;;  %s305_s4 = inlined_call_operand.vmem [shape: f32[1,8], index: 4, kind: input, shape index: {}]   ;;  %s306_s5 = inlined_call_operand.hbm [shape: f32[8,8], index: 5, kind: output, shape index: {}]  }
   0x1   :  { %v193_v0 = vld [vmem:[%s302_s1] sm:$0xff]  ;;  %v201_v2 = vld [vmem:[%s304_s3 + $0x38] sm:$0xff]  ;;  %v200_v4 = vld [vmem:[%s304_s3 + $0x30] sm:$0xff] }
   0x2   :  { %v22_v1 = vld [vmem:[%s301_s0] sm:$0xff]  ;;  %47 = vmatpush.bf16.msra.mxu0 %v193_v0  ;;  %125 = vmatpush.bf16.msra.mxu1 %v201_v2 }
   0x3   :  { %v23_v3 = vpack.c.bf16 %v22_v1, %v22_v1 }
   0x4   :  { %10 = vsyncpa [#allocation4], 0  ;;  %v199_v5 = vld [vmem:[%s304_s3 + $0x28] sm:$0xff]  ;;  %v198_v6 = vld [vmem:[%s304_s3 + $0x20] sm:$0xff]  ;;  %s231_s15 = smov [#allocation3]   ;;  %s147_s18 = sshll.u32 %s306_s5, 4  ;;  %s148_s18 = int_to_ptr.hbm [resolvable:$true] %s147_s18 }
   0x5   :  { %160 = vmatmul.msk.bf16.vlgmr.msra.gmra.mxu0 %vm36_vm0, %v23_v3  ;;  %v197_v7 = vld [vmem:[%s304_s3 + $0x18] sm:$0xff]  ;;  %v196_v8 = vld [vmem:[%s304_s3 + $0x10] sm:$0xff]  ;;  %v195_v9 = vld [vmem:[%s304_s3 + $0x8] sm:$0xff]  ;;  %s145_s16 = sshll.u32 %s231_s15, 4  ;;  %vm138_vm1 = vcmask 64512   ;;  %s146_s16 = int_to_ptr.vmem [resolvable:$true] %s145_s16 }
   0x6   :  { %126 = vmatpush.bf16.msra.mxu1 %v200_v4  ;;  %v194_v10 = vld [vmem:[%s304_s3] sm:$0xff] }
   0x7   :  { %v203_v11 = vld [vmem:[%s303_s2] ss:$0 sm:$0xff] }
   0x8   :  { %v204_v18 = vld [vmem:[%s305_s4] ss:$0 sm:$0xff] }
   0xa   :  { %127 = vmatpush.bf16.msra.mxu1 %v199_v5 }
   0xe   :  { %128 = vmatpush.bf16.msra.mxu1 %v198_v6 }
  0x12   :  { %129 = vmatpush.bf16.msra.mxu1 %v197_v7 }
  0x16   :  { %130 = vmatpush.bf16.msra.mxu1 %v196_v8 }
  0x1a   :  { %131 = vmatpush.bf16.msra.mxu1 %v195_v9 }
  0x1e   :  { %132 = vmatpush.bf16.msra.mxu1 %v194_v10 }
  0x82   :  { %v49_v12 = vpop.f32.mrf.mxu0 }
  0x83   :  { %v50_v13 = vadd.f32 %v203_v11, %v49_v12 }
  0x85   :  { %v53_v14 = vmax.f32 %v50_v13, 0.0 }
  0x87   :  { %v54_v15 = vpack.c.bf16 %v53_v14, %v53_v14 }
  0x89   :  { %55 = vst [vmem:[#allocation2] sm:$0xf] %v54_v15 }
  0x8a   :  { %v51_v16 = vpop.f32.mrf.mxu0 }
  0x90   :  { %v56_v17 = vld [vmem:[#allocation2] sm:$0xf] }
  0x91   :  { %133 = vmatmul.bf16.vlgmr.msra.gmra.mxu1 %v56_v17 }
 0x10e   :  { %v134_v19 = vpop.f32.mrf.mxu1 }
 0x10f   :  { %v135_v20 = vadd.f32 %v204_v18, %v134_v19 }
 0x111   :  { %139 = vst.msk [vmem:[#allocation3] sm:$0xff] %vm138_vm1, %v135_v20 }
 0x112   :  { %150 = dma.vmem_to_hbm [thread:$0]  %s146_s16, 128, %s148_s18, [#allocation4]  }
 0x116   :  { %v136_v21 = vpop.f32.mrf.mxu1 }
 0x117   :  { %229 = dma.done.wait [#allocation4], 128  }
 0x118   :  { %230 = vsyncadd [#allocation4], 4294967168 }
 0x119   :  { %155 = vsyncpa [#allocation4], 1 }

</bundles_post_ra>
